<compile_context>
chip_gen: v5e
topology: v5e:2x2
jax: 0.10.0
libtpu: 0.0.40
codegen_flags: <defaults>
</compile_context>

<pallas_src>
import functools

import jax
import jax.numpy as jnp
from jax.experimental import pallas as pl
from jax.experimental.pallas import tpu as pltpu

EPS = 1e-5
NEG_SLOPE = 0.01


def _transition_down_kernel(x_ref, pw2_ref, scale_ref, shift_ref, w_ref, b_ref,
                            o_ref, slab_ref, pooled_ref, *, C_in, C_out, THp,
                            neg_slope):
    """One (batch, pooled-row-tile) grid step.

    x_ref      : (1, C_in, THp, ds*W) VMEM  input tile (NCHW with H folded as
                                             (Hp, ds*W); W on lanes)
    pw2_ref    : (ds*W, Wp)           VMEM  combined H+W pooling matrix (1/ds^2)
    scale_ref, shift_ref : (C_in,)    SMEM  folded BatchNorm scale / shift
    w_ref      : (C_out, C_in)        SMEM  1x1-conv weights
    b_ref      : (C_out,)             SMEM  1x1-conv bias
    o_ref      : (1, C_out, THp, Wp)  VMEM  output tile
    slab_ref   : (C_in*THp, ds*W)     VMEM  scratch: activated slab (f32)
    pooled_ref : (C_in*THp, Wp)       VMEM  scratch: pooled slab (f32)
    """
    # 1) Fused BatchNorm (scale/shift) + LeakyReLU, per channel (SMEM scalar
    #    broadcast), written into one channel-stacked slab.
    for c in range(C_in):
        z = x_ref[0, c, :, :].astype(jnp.float32) * scale_ref[c] + shift_ref[c]
        z = jnp.where(z >= 0.0, z, neg_slope * z)
        slab_ref[c * THp:(c + 1) * THp, :] = z

    # 2) Both average pools (rows via the ds*W folding, cols via pw2) as ONE
    #    MXU matmul over the whole slab: M = C_in*THp, K = ds*W, N = Wp.
    pooled_ref[...] = jnp.dot(slab_ref[...], pw2_ref[...],
                              preferred_element_type=jnp.float32)

    # 3) 1x1 conv channel mix: stream over input channels, a single (THp, Wp)
    #    accumulator live at a time, bias added at the end.
    for co in range(C_out):
        acc = pooled_ref[0:THp, :] * w_ref[co, 0]
        for ci in range(1, C_in):
            acc = acc + pooled_ref[ci * THp:(ci + 1) * THp, :] * w_ref[co, ci]
        o_ref[0, co, :, :] = (acc + b_ref[co]).astype(o_ref.dtype)


def _pick_tile_hp(Hp, row_bytes, itemsize, budget_bytes=4 << 20):
    """Pooled-row tile height THp: multiple of the sublane packing (8 for f32,
    16 for bf16) that divides Hp, with input tile <= ~budget_bytes.
    Falls back to the full extent (always a legal block shape)."""
    step = 8 * max(1, 4 // int(itemsize))
    if Hp * row_bytes <= budget_bytes or Hp % step != 0:
        return Hp
    cap = max(step, int(budget_bytes // row_bytes) // step * step)
    th = min(cap, Hp)
    th = (th // step) * step
    while th >= step:
        if Hp % th == 0:
            return th
        th -= step
    return Hp  # TODO(synk): awkward Hp may exceed the budget here.


def transition_down(x_nchw, weight, bias, gamma, beta, running_mean,
                    running_var, down_size=2):
    """x_nchw: (N, C_in, H, W) in f32 or bf16.  weight: (C_out, C_in) or
    (C_out, C_in, 1, 1).  Returns (N, C_out, H//ds, W//ds), same dtype as x."""
    N, C_in, H, W = x_nchw.shape
    w2d = jnp.asarray(weight, jnp.float32).reshape(weight.shape[0], -1)
    C_out = w2d.shape[0]
    ds = int(down_size) if down_size else 1
    assert H % ds == 0 and W % ds == 0

    # Fold eval-mode BatchNorm into one per-channel scale & shift.
    var = jnp.asarray(running_var, jnp.float32)
    scale = jnp.asarray(gamma, jnp.float32) * jax.lax.rsqrt(var + EPS)
    shift = (jnp.asarray(beta, jnp.float32)
             - jnp.asarray(running_mean, jnp.float32) * scale)

    Hp, Wp, dsW = H // ds, W // ds, ds * W
    itemsize = jnp.dtype(x_nchw.dtype).itemsize
    THp = _pick_tile_hp(Hp, C_in * dsW * itemsize, itemsize)
    grid = (N, Hp // THp)

    # Combined H+W pooling matrix: column m of a folded row covers
    # (dI, w) = (m // W, m % W); it contributes to output column J = w // ds
    # with weight 1/ds^2 (the row sum over dI does the H-pool).
    m = jnp.arange(dsW)
    pw2 = jnp.where((m[:, None] % W) // ds == jnp.arange(Wp)[None, :],
                    1.0 / (ds * ds), 0.0).astype(jnp.float32)

    # Free (contiguous) HBM reshape: fold each ds-row group into the lane axis.
    x_r = x_nchw.reshape(N, C_in, Hp, dsW)

    kernel = functools.partial(_transition_down_kernel, C_in=C_in, C_out=C_out,
                               THp=THp, neg_slope=NEG_SLOPE)
    smem = pltpu.MemorySpace.SMEM

    out = pl.pallas_call(
        kernel,
        out_shape=jax.ShapeDtypeStruct((N, C_out, Hp, Wp), x_nchw.dtype),
        grid_spec=pltpu.PrefetchScalarGridSpec(
            num_scalar_prefetch=0,
            grid=grid,
            in_specs=[
                pl.BlockSpec((1, C_in, THp, dsW), lambda n, h: (n, 0, h, 0)),  # x
                pl.BlockSpec((dsW, Wp), lambda n, h: (0, 0)),                  # pw2
                pl.BlockSpec(memory_space=smem),                               # bn scale
                pl.BlockSpec(memory_space=smem),                               # bn shift
                pl.BlockSpec(memory_space=smem),                               # conv weight
                pl.BlockSpec(memory_space=smem),                               # conv bias
            ],
            out_specs=pl.BlockSpec((1, C_out, THp, Wp),
                                   lambda n, h: (n, 0, h, 0)),
            scratch_shapes=[
                pltpu.VMEM((C_in * THp, dsW), jnp.float32),   # activated slab
                pltpu.VMEM((C_in * THp, Wp), jnp.float32),    # pooled slab
            ],
        ),
        compiler_params=pltpu.CompilerParams(
            dimension_semantics=("parallel", "parallel"),
            vmem_limit_bytes=32 << 20),
    )(x_r, pw2, scale, shift, w2d, jnp.asarray(bias, jnp.float32))

    return out


def _reference(x, weight, bias, gamma, beta, mean, var, ds):
    # Pure-JAX reference (conv then pool, like the PyTorch module).
    inv_std = jax.lax.rsqrt(var + EPS)
    xn = (x - mean[None, :, None, None]) * (inv_std * gamma)[None, :, None, None] \
         + beta[None, :, None, None]
    xa = jnp.where(xn >= 0, xn, NEG_SLOPE * xn)
    y = jnp.einsum('nchw,oc->nohw', xa, weight) + bias[None, :, None, None]
    N, Co, H, W = y.shape
    return y.reshape(N, Co, H // ds, ds, W // ds, ds).mean(axis=(3, 5))


if __name__ == "__main__":
    key = jax.random.PRNGKey(0)
    N, C_in, C_out, H, W = 2, 4, 8, 16, 16
    down_size = 2

    k = jax.random.split(key, 8)
    x = jax.random.normal(k[0], (N, C_in, H, W), dtype=jnp.float32)

    # Deterministic synthetic parameters (shapes per module __init__).
    weight = jax.random.normal(k[1], (C_out, C_in), dtype=jnp.float32) * 0.1  # 1x1 conv
    bias = jax.random.normal(k[2], (C_out,), dtype=jnp.float32) * 0.1
    gamma = 1.0 + 0.1 * jax.random.normal(k[3], (C_in,), dtype=jnp.float32)
    beta = 0.1 * jax.random.normal(k[4], (C_in,), dtype=jnp.float32)
    running_mean = 0.1 * jax.random.normal(k[5], (C_in,), dtype=jnp.float32)
    running_var = jnp.abs(1.0 + 0.1 * jax.random.normal(k[6], (C_in,), dtype=jnp.float32))

    ref = _reference(x, weight, bias, gamma, beta,
                     running_mean, running_var, down_size)

    # f32 path
    out = jax.block_until_ready(
        transition_down(x, weight, bias, gamma, beta,
                        running_mean, running_var, down_size))
    assert out.shape == (N, C_out, H // down_size, W // down_size)
    assert out.dtype == x.dtype
    assert jnp.allclose(out, ref, atol=1e-4, rtol=1e-4)

    # bf16 activation path (no wrapper up-cast; kernel up-casts after the DMA).
    out_bf16 = jax.block_until_ready(
        transition_down(x.astype(jnp.bfloat16), weight, bias, gamma, beta,
                        running_mean, running_var, down_size))
    assert out_bf16.dtype == jnp.bfloat16
    assert jnp.allclose(out_bf16.astype(jnp.float32), ref, atol=5e-2, rtol=5e-2)

    print("KERNEL_OK")
</pallas_src>

<mosaic_0001>
module attributes {stable_mosaic.version = 11 : i64} {
  func.func @_transition_down_kernel(%arg0: i32, %arg1: i32, %arg2: memref<1x4x8x32xf32, #tpu.memory_space<vmem>>, %arg3: memref<32x8xf32, #tpu.memory_space<vmem>>, %arg4: memref<4xf32, #tpu.memory_space<smem>>, %arg5: memref<4xf32, #tpu.memory_space<smem>>, %arg6: memref<8x4xf32, #tpu.memory_space<smem>>, %arg7: memref<8xf32, #tpu.memory_space<smem>>, %arg8: memref<1x8x8x8xf32, #tpu.memory_space<vmem>>, %arg9: memref<32x32xf32, #tpu.memory_space<vmem>>, %arg10: memref<32x8xf32, #tpu.memory_space<vmem>>) attributes {dimension_semantics = [#tpu.dimension_semantics<parallel>, #tpu.dimension_semantics<parallel>], iteration_bounds = array<i64: 2, 1>, scalar_prefetch = 0 : i64, scratch_operands = 2 : i64, tpu.core_type = #tpu.core_type<tc>, window_params = [{transform_indices = @transform_0, window_bounds = array<i64: 1, 4, 8, 32>}, {pipeline_mode = #tpu.pipeline_mode<synchronous>, transform_indices = @transform_1, window_bounds = array<i64: 32, 8>}, {transform_indices = @transform_2, window_bounds = array<i64: 4>}, {transform_indices = @transform_3, window_bounds = array<i64: 4>}, {transform_indices = @transform_4, window_bounds = array<i64: 8, 4>}, {transform_indices = @transform_5, window_bounds = array<i64: 8>}, {transform_indices = @transform_6, window_bounds = array<i64: 1, 8, 8, 8>}]} {
    %c0 = arith.constant 0 : index
    %c0_0 = arith.constant 0 : index
    %c0_1 = arith.constant 0 : index
    %c0_2 = arith.constant 0 : index
    %0 = vector.load %arg2[%c0, %c0_0, %c0_1, %c0_2] : memref<1x4x8x32xf32, #tpu.memory_space<vmem>>, vector<1x1x8x32xf32>
    %1 = vector.shape_cast %0 : vector<1x1x8x32xf32> to vector<8x32xf32>
    %c0_3 = arith.constant 0 : index
    %2 = memref.load %arg4[%c0_3] : memref<4xf32, #tpu.memory_space<smem>>
    %3 = vector.broadcast %2 : f32 to vector<8x32xf32>
    %4 = arith.mulf %1, %3 : vector<8x32xf32>
    %c0_4 = arith.constant 0 : index
    %5 = memref.load %arg5[%c0_4] : memref<4xf32, #tpu.memory_space<smem>>
    %6 = vector.broadcast %5 : f32 to vector<8x32xf32>
    %7 = arith.addf %4, %6 : vector<8x32xf32>
    %cst = arith.constant 0.000000e+00 : f32
    %8 = vector.broadcast %cst : f32 to vector<8x32xf32>
    %9 = arith.cmpf oge, %7, %8 : vector<8x32xf32>
    %cst_5 = arith.constant 0.00999999977 : f32
    %10 = vector.broadcast %cst_5 : f32 to vector<8x32xf32>
    %11 = arith.mulf %10, %7 : vector<8x32xf32>
    %12 = arith.select %9, %7, %11 : vector<8x32xi1>, vector<8x32xf32>
    %c0_6 = arith.constant 0 : index
    %c0_7 = arith.constant 0 : index
    %13 = vector.load %arg9[%c0_6, %c0_7] : memref<32x32xf32, #tpu.memory_space<vmem>>, vector<8x32xf32>
    tpu.vector_store %arg9[%c0_6, %c0_7], %12 {strides = array<i32>} : memref<32x32xf32, #tpu.memory_space<vmem>>, vector<8x32xf32>,
    %c0_8 = arith.constant 0 : index
    %c1 = arith.constant 1 : index
    %c0_9 = arith.constant 0 : index
    %c0_10 = arith.constant 0 : index
    %14 = vector.load %arg2[%c0_8, %c1, %c0_9, %c0_10] : memref<1x4x8x32xf32, #tpu.memory_space<vmem>>, vector<1x1x8x32xf32>
    %15 = vector.shape_cast %14 : vector<1x1x8x32xf32> to vector<8x32xf32>
    %c1_11 = arith.constant 1 : index
    %16 = memref.load %arg4[%c1_11] : memref<4xf32, #tpu.memory_space<smem>>
    %17 = vector.broadcast %16 : f32 to vector<8x32xf32>
    %18 = arith.mulf %15, %17 : vector<8x32xf32>
    %c1_12 = arith.constant 1 : index
    %19 = memref.load %arg5[%c1_12] : memref<4xf32, #tpu.memory_space<smem>>
    %20 = vector.broadcast %19 : f32 to vector<8x32xf32>
    %21 = arith.addf %18, %20 : vector<8x32xf32>
    %cst_13 = arith.constant 0.000000e+00 : f32
    %22 = vector.broadcast %cst_13 : f32 to vector<8x32xf32>
    %23 = arith.cmpf oge, %21, %22 : vector<8x32xf32>
    %cst_14 = arith.constant 0.00999999977 : f32
    %24 = vector.broadcast %cst_14 : f32 to vector<8x32xf32>
    %25 = arith.mulf %24, %21 : vector<8x32xf32>
    %26 = arith.select %23, %21, %25 : vector<8x32xi1>, vector<8x32xf32>
    %c8 = arith.constant 8 : index
    %c0_15 = arith.constant 0 : index
    %27 = vector.load %arg9[%c8, %c0_15] : memref<32x32xf32, #tpu.memory_space<vmem>>, vector<8x32xf32>
    tpu.vector_store %arg9[%c8, %c0_15], %26 {strides = array<i32>} : memref<32x32xf32, #tpu.memory_space<vmem>>, vector<8x32xf32>,
    %c0_16 = arith.constant 0 : index
    %c2 = arith.constant 2 : index
    %c0_17 = arith.constant 0 : index
    %c0_18 = arith.constant 0 : index
    %28 = vector.load %arg2[%c0_16, %c2, %c0_17, %c0_18] : memref<1x4x8x32xf32, #tpu.memory_space<vmem>>, vector<1x1x8x32xf32>
    %29 = vector.shape_cast %28 : vector<1x1x8x32xf32> to vector<8x32xf32>
    %c2_19 = arith.constant 2 : index
    %30 = memref.load %arg4[%c2_19] : memref<4xf32, #tpu.memory_space<smem>>
    %31 = vector.broadcast %30 : f32 to vector<8x32xf32>
    %32 = arith.mulf %29, %31 : vector<8x32xf32>
    %c2_20 = arith.constant 2 : index
    %33 = memref.load %arg5[%c2_20] : memref<4xf32, #tpu.memory_space<smem>>
    %34 = vector.broadcast %33 : f32 to vector<8x32xf32>
    %35 = arith.addf %32, %34 : vector<8x32xf32>
    %cst_21 = arith.constant 0.000000e+00 : f32
    %36 = vector.broadcast %cst_21 : f32 to vector<8x32xf32>
    %37 = arith.cmpf oge, %35, %36 : vector<8x32xf32>
    %cst_22 = arith.constant 0.00999999977 : f32
    %38 = vector.broadcast %cst_22 : f32 to vector<8x32xf32>
    %39 = arith.mulf %38, %35 : vector<8x32xf32>
    %40 = arith.select %37, %35, %39 : vector<8x32xi1>, vector<8x32xf32>
    %c16 = arith.constant 16 : index
    %c0_23 = arith.constant 0 : index
    %41 = vector.load %arg9[%c16, %c0_23] : memref<32x32xf32, #tpu.memory_space<vmem>>, vector<8x32xf32>
    tpu.vector_store %arg9[%c16, %c0_23], %40 {strides = array<i32>} : memref<32x32xf32, #tpu.memory_space<vmem>>, vector<8x32xf32>,
    %c0_24 = arith.constant 0 : index
    %c3 = arith.constant 3 : index
    %c0_25 = arith.constant 0 : index
    %c0_26 = arith.constant 0 : index
    %42 = vector.load %arg2[%c0_24, %c3, %c0_25, %c0_26] : memref<1x4x8x32xf32, #tpu.memory_space<vmem>>, vector<1x1x8x32xf32>
    %43 = vector.shape_cast %42 : vector<1x1x8x32xf32> to vector<8x32xf32>
    %c3_27 = arith.constant 3 : index
    %44 = memref.load %arg4[%c3_27] : memref<4xf32, #tpu.memory_space<smem>>
    %45 = vector.broadcast %44 : f32 to vector<8x32xf32>
    %46 = arith.mulf %43, %45 : vector<8x32xf32>
    %c3_28 = arith.constant 3 : index
    %47 = memref.load %arg5[%c3_28] : memref<4xf32, #tpu.memory_space<smem>>
    %48 = vector.broadcast %47 : f32 to vector<8x32xf32>
    %49 = arith.addf %46, %48 : vector<8x32xf32>
    %cst_29 = arith.constant 0.000000e+00 : f32
    %50 = vector.broadcast %cst_29 : f32 to vector<8x32xf32>
    %51 = arith.cmpf oge, %49, %50 : vector<8x32xf32>
    %cst_30 = arith.constant 0.00999999977 : f32
    %52 = vector.broadcast %cst_30 : f32 to vector<8x32xf32>
    %53 = arith.mulf %52, %49 : vector<8x32xf32>
    %54 = arith.select %51, %49, %53 : vector<8x32xi1>, vector<8x32xf32>
    %c24 = arith.constant 24 : index
    %c0_31 = arith.constant 0 : index
    %55 = vector.load %arg9[%c24, %c0_31] : memref<32x32xf32, #tpu.memory_space<vmem>>, vector<8x32xf32>
    tpu.vector_store %arg9[%c24, %c0_31], %54 {strides = array<i32>} : memref<32x32xf32, #tpu.memory_space<vmem>>, vector<8x32xf32>,
    %c0_32 = arith.constant 0 : index
    %c0_33 = arith.constant 0 : index
    %56 = vector.load %arg9[%c0_32, %c0_33] : memref<32x32xf32, #tpu.memory_space<vmem>>, vector<32x32xf32>
    %c0_34 = arith.constant 0 : index
    %c0_35 = arith.constant 0 : index
    %57 = vector.load %arg3[%c0_34, %c0_35] : memref<32x8xf32, #tpu.memory_space<vmem>>, vector<32x8xf32>
    %cst_36 = arith.constant dense<0.000000e+00> : vector<32x8xf32>
    %58 = tpu.matmul %56, %57, %cst_36 {dimension_numbers = #tpu.dot_dimension_numbers<[1], [0], [0], [1], [0, 0, 1, 1], [], []>} : vector<32x32xf32>, vector<32x8xf32>, vector<32x8xf32> -> vector<32x8xf32>
    %c0_37 = arith.constant 0 : index
    %c0_38 = arith.constant 0 : index
    %59 = vector.load %arg10[%c0_37, %c0_38] : memref<32x8xf32, #tpu.memory_space<vmem>>, vector<32x8xf32>
    tpu.vector_store %arg10[%c0_37, %c0_38], %58 {strides = array<i32>} : memref<32x8xf32, #tpu.memory_space<vmem>>, vector<32x8xf32>,
    %c0_39 = arith.constant 0 : index
    %c0_40 = arith.constant 0 : index
    %60 = vector.load %arg10[%c0_39, %c0_40] : memref<32x8xf32, #tpu.memory_space<vmem>>, vector<8x8xf32>
    %c0_41 = arith.constant 0 : index
    %c0_42 = arith.constant 0 : index
    %61 = memref.load %arg6[%c0_41, %c0_42] : memref<8x4xf32, #tpu.memory_space<smem>>
    %62 = vector.broadcast %61 : f32 to vector<8x8xf32>
    %63 = arith.mulf %60, %62 : vector<8x8xf32>
    %c8_43 = arith.constant 8 : index
    %c0_44 = arith.constant 0 : index
    %64 = vector.load %arg10[%c8_43, %c0_44] : memref<32x8xf32, #tpu.memory_space<vmem>>, vector<8x8xf32>
    %c0_45 = arith.constant 0 : index
    %c1_46 = arith.constant 1 : index
    %65 = memref.load %arg6[%c0_45, %c1_46] : memref<8x4xf32, #tpu.memory_space<smem>>
    %66 = vector.broadcast %65 : f32 to vector<8x8xf32>
    %67 = arith.mulf %64, %66 : vector<8x8xf32>
    %68 = arith.addf %63, %67 : vector<8x8xf32>
    %c16_47 = arith.constant 16 : index
    %c0_48 = arith.constant 0 : index
    %69 = vector.load %arg10[%c16_47, %c0_48] : memref<32x8xf32, #tpu.memory_space<vmem>>, vector<8x8xf32>
    %c0_49 = arith.constant 0 : index
    %c2_50 = arith.constant 2 : index
    %70 = memref.load %arg6[%c0_49, %c2_50] : memref<8x4xf32, #tpu.memory_space<smem>>
    %71 = vector.broadcast %70 : f32 to vector<8x8xf32>
    %72 = arith.mulf %69, %71 : vector<8x8xf32>
    %73 = arith.addf %68, %72 : vector<8x8xf32>
    %c24_51 = arith.constant 24 : index
    %c0_52 = arith.constant 0 : index
    %74 = vector.load %arg10[%c24_51, %c0_52] : memref<32x8xf32, #tpu.memory_space<vmem>>, vector<8x8xf32>
    %c0_53 = arith.constant 0 : index
    %c3_54 = arith.constant 3 : index
    %75 = memref.load %arg6[%c0_53, %c3_54] : memref<8x4xf32, #tpu.memory_space<smem>>
    %76 = vector.broadcast %75 : f32 to vector<8x8xf32>
    %77 = arith.mulf %74, %76 : vector<8x8xf32>
    %78 = arith.addf %73, %77 : vector<8x8xf32>
    %c0_55 = arith.constant 0 : index
    %79 = memref.load %arg7[%c0_55] : memref<8xf32, #tpu.memory_space<smem>>
    %80 = vector.broadcast %79 : f32 to vector<8x8xf32>
    %81 = arith.addf %78, %80 : vector<8x8xf32>
    %c0_56 = arith.constant 0 : index
    %c0_57 = arith.constant 0 : index
    %c0_58 = arith.constant 0 : index
    %c0_59 = arith.constant 0 : index
    %82 = vector.load %arg8[%c0_56, %c0_57, %c0_58, %c0_59] : memref<1x8x8x8xf32, #tpu.memory_space<vmem>>, vector<1x1x8x8xf32>
    %83 = vector.shape_cast %82 : vector<1x1x8x8xf32> to vector<8x8xf32>
    %84 = vector.shape_cast %81 : vector<8x8xf32> to vector<1x1x8x8xf32>
    tpu.vector_store %arg8[%c0_56, %c0_57, %c0_58, %c0_59], %84 {strides = array<i32>} : memref<1x8x8x8xf32, #tpu.memory_space<vmem>>, vector<1x1x8x8xf32>,
    %c0_60 = arith.constant 0 : index
    %c0_61 = arith.constant 0 : index
    %85 = vector.load %arg10[%c0_60, %c0_61] : memref<32x8xf32, #tpu.memory_space<vmem>>, vector<8x8xf32>
    %c1_62 = arith.constant 1 : index
    %c0_63 = arith.constant 0 : index
    %86 = memref.load %arg6[%c1_62, %c0_63] : memref<8x4xf32, #tpu.memory_space<smem>>
    %87 = vector.broadcast %86 : f32 to vector<8x8xf32>
    %88 = arith.mulf %85, %87 : vector<8x8xf32>
    %c8_64 = arith.constant 8 : index
    %c0_65 = arith.constant 0 : index
    %89 = vector.load %arg10[%c8_64, %c0_65] : memref<32x8xf32, #tpu.memory_space<vmem>>, vector<8x8xf32>
    %c1_66 = arith.constant 1 : index
    %c1_67 = arith.constant 1 : index
    %90 = memref.load %arg6[%c1_66, %c1_67] : memref<8x4xf32, #tpu.memory_space<smem>>
    %91 = vector.broadcast %90 : f32 to vector<8x8xf32>
    %92 = arith.mulf %89, %91 : vector<8x8xf32>
    %93 = arith.addf %88, %92 : vector<8x8xf32>
    %c16_68 = arith.constant 16 : index
    %c0_69 = arith.constant 0 : index
    %94 = vector.load %arg10[%c16_68, %c0_69] : memref<32x8xf32, #tpu.memory_space<vmem>>, vector<8x8xf32>
    %c1_70 = arith.constant 1 : index
    %c2_71 = arith.constant 2 : index
    %95 = memref.load %arg6[%c1_70, %c2_71] : memref<8x4xf32, #tpu.memory_space<smem>>
    %96 = vector.broadcast %95 : f32 to vector<8x8xf32>
    %97 = arith.mulf %94, %96 : vector<8x8xf32>
    %98 = arith.addf %93, %97 : vector<8x8xf32>
    %c24_72 = arith.constant 24 : index
    %c0_73 = arith.constant 0 : index
    %99 = vector.load %arg10[%c24_72, %c0_73] : memref<32x8xf32, #tpu.memory_space<vmem>>, vector<8x8xf32>
    %c1_74 = arith.constant 1 : index
    %c3_75 = arith.constant 3 : index
    %100 = memref.load %arg6[%c1_74, %c3_75] : memref<8x4xf32, #tpu.memory_space<smem>>
    %101 = vector.broadcast %100 : f32 to vector<8x8xf32>
    %102 = arith.mulf %99, %101 : vector<8x8xf32>
    %103 = arith.addf %98, %102 : vector<8x8xf32>
    %c1_76 = arith.constant 1 : index
    %104 = memref.load %arg7[%c1_76] : memref<8xf32, #tpu.memory_space<smem>>
    %105 = vector.broadcast %104 : f32 to vector<8x8xf32>
    %106 = arith.addf %103, %105 : vector<8x8xf32>
    %c0_77 = arith.constant 0 : index
    %c1_78 = arith.constant 1 : index
    %c0_79 = arith.constant 0 : index
    %c0_80 = arith.constant 0 : index
    %107 = vector.load %arg8[%c0_77, %c1_78, %c0_79, %c0_80] : memref<1x8x8x8xf32, #tpu.memory_space<vmem>>, vector<1x1x8x8xf32>
    %108 = vector.shape_cast %107 : vector<1x1x8x8xf32> to vector<8x8xf32>
    %109 = vector.shape_cast %106 : vector<8x8xf32> to vector<1x1x8x8xf32>
    tpu.vector_store %arg8[%c0_77, %c1_78, %c0_79, %c0_80], %109 {strides = array<i32>} : memref<1x8x8x8xf32, #tpu.memory_space<vmem>>, vector<1x1x8x8xf32>,
    %c0_81 = arith.constant 0 : index
    %c0_82 = arith.constant 0 : index
    %110 = vector.load %arg10[%c0_81, %c0_82] : memref<32x8xf32, #tpu.memory_space<vmem>>, vector<8x8xf32>
    %c2_83 = arith.constant 2 : index
    %c0_84 = arith.constant 0 : index
    %111 = memref.load %arg6[%c2_83, %c0_84] : memref<8x4xf32, #tpu.memory_space<smem>>
    %112 = vector.broadcast %111 : f32 to vector<8x8xf32>
    %113 = arith.mulf %110, %112 : vector<8x8xf32>
    %c8_85 = arith.constant 8 : index
    %c0_86 = arith.constant 0 : index
    %114 = vector.load %arg10[%c8_85, %c0_86] : memref<32x8xf32, #tpu.memory_space<vmem>>, vector<8x8xf32>
    %c2_87 = arith.constant 2 : index
    %c1_88 = arith.constant 1 : index
    %115 = memref.load %arg6[%c2_87, %c1_88] : memref<8x4xf32, #tpu.memory_space<smem>>
    %116 = vector.broadcast %115 : f32 to vector<8x8xf32>
    %117 = arith.mulf %114, %116 : vector<8x8xf32>
    %118 = arith.addf %113, %117 : vector<8x8xf32>
    %c16_89 = arith.constant 16 : index
    %c0_90 = arith.constant 0 : index
    %119 = vector.load %arg10[%c16_89, %c0_90] : memref<32x8xf32, #tpu.memory_space<vmem>>, vector<8x8xf32>
    %c2_91 = arith.constant 2 : index
    %c2_92 = arith.constant 2 : index
    %120 = memref.load %arg6[%c2_91, %c2_92] : memref<8x4xf32, #tpu.memory_space<smem>>
    %121 = vector.broadcast %120 : f32 to vector<8x8xf32>
    %122 = arith.mulf %119, %121 : vector<8x8xf32>
    %123 = arith.addf %118, %122 : vector<8x8xf32>
    %c24_93 = arith.constant 24 : index
    %c0_94 = arith.constant 0 : index
    %124 = vector.load %arg10[%c24_93, %c0_94] : memref<32x8xf32, #tpu.memory_space<vmem>>, vector<8x8xf32>
    %c2_95 = arith.constant 2 : index
    %c3_96 = arith.constant 3 : index
    %125 = memref.load %arg6[%c2_95, %c3_96] : memref<8x4xf32, #tpu.memory_space<smem>>
    %126 = vector.broadcast %125 : f32 to vector<8x8xf32>
    %127 = arith.mulf %124, %126 : vector<8x8xf32>
    %128 = arith.addf %123, %127 : vector<8x8xf32>
    %c2_97 = arith.constant 2 : index
    %129 = memref.load %arg7[%c2_97] : memref<8xf32, #tpu.memory_space<smem>>
    %130 = vector.broadcast %129 : f32 to vector<8x8xf32>
    %131 = arith.addf %128, %130 : vector<8x8xf32>
    %c0_98 = arith.constant 0 : index
    %c2_99 = arith.constant 2 : index
    %c0_100 = arith.constant 0 : index
    %c0_101 = arith.constant 0 : index
    %132 = vector.load %arg8[%c0_98, %c2_99, %c0_100, %c0_101] : memref<1x8x8x8xf32, #tpu.memory_space<vmem>>, vector<1x1x8x8xf32>
    %133 = vector.shape_cast %132 : vector<1x1x8x8xf32> to vector<8x8xf32>
    %134 = vector.shape_cast %131 : vector<8x8xf32> to vector<1x1x8x8xf32>
    tpu.vector_store %arg8[%c0_98, %c2_99, %c0_100, %c0_101], %134 {strides = array<i32>} : memref<1x8x8x8xf32, #tpu.memory_space<vmem>>, vector<1x1x8x8xf32>,
    %c0_102 = arith.constant 0 : index
    %c0_103 = arith.constant 0 : index
    %135 = vector.load %arg10[%c0_102, %c0_103] : memref<32x8xf32, #tpu.memory_space<vmem>>, vector<8x8xf32>
    %c3_104 = arith.constant 3 : index
    %c0_105 = arith.constant 0 : index
    %136 = memref.load %arg6[%c3_104, %c0_105] : memref<8x4xf32, #tpu.memory_space<smem>>
    %137 = vector.broadcast %136 : f32 to vector<8x8xf32>
    %138 = arith.mulf %135, %137 : vector<8x8xf32>
    %c8_106 = arith.constant 8 : index
    %c0_107 = arith.constant 0 : index
    %139 = vector.load %arg10[%c8_106, %c0_107] : memref<32x8xf32, #tpu.memory_space<vmem>>, vector<8x8xf32>
    %c3_108 = arith.constant 3 : index
    %c1_109 = arith.constant 1 : index
    %140 = memref.load %arg6[%c3_108, %c1_109] : memref<8x4xf32, #tpu.memory_space<smem>>
    %141 = vector.broadcast %140 : f32 to vector<8x8xf32>
    %142 = arith.mulf %139, %141 : vector<8x8xf32>
    %143 = arith.addf %138, %142 : vector<8x8xf32>
    %c16_110 = arith.constant 16 : index
    %c0_111 = arith.constant 0 : index
    %144 = vector.load %arg10[%c16_110, %c0_111] : memref<32x8xf32, #tpu.memory_space<vmem>>, vector<8x8xf32>
    %c3_112 = arith.constant 3 : index
    %c2_113 = arith.constant 2 : index
    %145 = memref.load %arg6[%c3_112, %c2_113] : memref<8x4xf32, #tpu.memory_space<smem>>
    %146 = vector.broadcast %145 : f32 to vector<8x8xf32>
    %147 = arith.mulf %144, %146 : vector<8x8xf32>
    %148 = arith.addf %143, %147 : vector<8x8xf32>
    %c24_114 = arith.constant 24 : index
    %c0_115 = arith.constant 0 : index
    %149 = vector.load %arg10[%c24_114, %c0_115] : memref<32x8xf32, #tpu.memory_space<vmem>>, vector<8x8xf32>
    %c3_116 = arith.constant 3 : index
    %c3_117 = arith.constant 3 : index
    %150 = memref.load %arg6[%c3_116, %c3_117] : memref<8x4xf32, #tpu.memory_space<smem>>
    %151 = vector.broadcast %150 : f32 to vector<8x8xf32>
    %152 = arith.mulf %149, %151 : vector<8x8xf32>
    %153 = arith.addf %148, %152 : vector<8x8xf32>
    %c3_118 = arith.constant 3 : index
    %154 = memref.load %arg7[%c3_118] : memref<8xf32, #tpu.memory_space<smem>>
    %155 = vector.broadcast %154 : f32 to vector<8x8xf32>
    %156 = arith.addf %153, %155 : vector<8x8xf32>
    %c0_119 = arith.constant 0 : index
    %c3_120 = arith.constant 3 : index
    %c0_121 = arith.constant 0 : index
    %c0_122 = arith.constant 0 : index
    %157 = vector.load %arg8[%c0_119, %c3_120, %c0_121, %c0_122] : memref<1x8x8x8xf32, #tpu.memory_space<vmem>>, vector<1x1x8x8xf32>
    %158 = vector.shape_cast %157 : vector<1x1x8x8xf32> to vector<8x8xf32>
    %159 = vector.shape_cast %156 : vector<8x8xf32> to vector<1x1x8x8xf32>
    tpu.vector_store %arg8[%c0_119, %c3_120, %c0_121, %c0_122], %159 {strides = array<i32>} : memref<1x8x8x8xf32, #tpu.memory_space<vmem>>, vector<1x1x8x8xf32>,
    %c0_123 = arith.constant 0 : index
    %c0_124 = arith.constant 0 : index
    %160 = vector.load %arg10[%c0_123, %c0_124] : memref<32x8xf32, #tpu.memory_space<vmem>>, vector<8x8xf32>
    %c4 = arith.constant 4 : index
    %c0_125 = arith.constant 0 : index
    %161 = memref.load %arg6[%c4, %c0_125] : memref<8x4xf32, #tpu.memory_space<smem>>
    %162 = vector.broadcast %161 : f32 to vector<8x8xf32>
    %163 = arith.mulf %160, %162 : vector<8x8xf32>
    %c8_126 = arith.constant 8 : index
    %c0_127 = arith.constant 0 : index
    %164 = vector.load %arg10[%c8_126, %c0_127] : memref<32x8xf32, #tpu.memory_space<vmem>>, vector<8x8xf32>
    %c4_128 = arith.constant 4 : index
    %c1_129 = arith.constant 1 : index
    %165 = memref.load %arg6[%c4_128, %c1_129] : memref<8x4xf32, #tpu.memory_space<smem>>
    %166 = vector.broadcast %165 : f32 to vector<8x8xf32>
    %167 = arith.mulf %164, %166 : vector<8x8xf32>
    %168 = arith.addf %163, %167 : vector<8x8xf32>
    %c16_130 = arith.constant 16 : index
    %c0_131 = arith.constant 0 : index
    %169 = vector.load %arg10[%c16_130, %c0_131] : memref<32x8xf32, #tpu.memory_space<vmem>>, vector<8x8xf32>
    %c4_132 = arith.constant 4 : index
    %c2_133 = arith.constant 2 : index
    %170 = memref.load %arg6[%c4_132, %c2_133] : memref<8x4xf32, #tpu.memory_space<smem>>
    %171 = vector.broadcast %170 : f32 to vector<8x8xf32>
    %172 = arith.mulf %169, %171 : vector<8x8xf32>
    %173 = arith.addf %168, %172 : vector<8x8xf32>
    %c24_134 = arith.constant 24 : index
    %c0_135 = arith.constant 0 : index
    %174 = vector.load %arg10[%c24_134, %c0_135] : memref<32x8xf32, #tpu.memory_space<vmem>>, vector<8x8xf32>
    %c4_136 = arith.constant 4 : index
    %c3_137 = arith.constant 3 : index
    %175 = memref.load %arg6[%c4_136, %c3_137] : memref<8x4xf32, #tpu.memory_space<smem>>
    %176 = vector.broadcast %175 : f32 to vector<8x8xf32>
    %177 = arith.mulf %174, %176 : vector<8x8xf32>
    %178 = arith.addf %173, %177 : vector<8x8xf32>
    %c4_138 = arith.constant 4 : index
    %179 = memref.load %arg7[%c4_138] : memref<8xf32, #tpu.memory_space<smem>>
    %180 = vector.broadcast %179 : f32 to vector<8x8xf32>
    %181 = arith.addf %178, %180 : vector<8x8xf32>
    %c0_139 = arith.constant 0 : index
    %c4_140 = arith.constant 4 : index
    %c0_141 = arith.constant 0 : index
    %c0_142 = arith.constant 0 : index
    %182 = vector.load %arg8[%c0_139, %c4_140, %c0_141, %c0_142] : memref<1x8x8x8xf32, #tpu.memory_space<vmem>>, vector<1x1x8x8xf32>
    %183 = vector.shape_cast %182 : vector<1x1x8x8xf32> to vector<8x8xf32>
    %184 = vector.shape_cast %181 : vector<8x8xf32> to vector<1x1x8x8xf32>
    tpu.vector_store %arg8[%c0_139, %c4_140, %c0_141, %c0_142], %184 {strides = array<i32>} : memref<1x8x8x8xf32, #tpu.memory_space<vmem>>, vector<1x1x8x8xf32>,
    %c0_143 = arith.constant 0 : index
    %c0_144 = arith.constant 0 : index
    %185 = vector.load %arg10[%c0_143, %c0_144] : memref<32x8xf32, #tpu.memory_space<vmem>>, vector<8x8xf32>
    %c5 = arith.constant 5 : index
    %c0_145 = arith.constant 0 : index
    %186 = memref.load %arg6[%c5, %c0_145] : memref<8x4xf32, #tpu.memory_space<smem>>
    %187 = vector.broadcast %186 : f32 to vector<8x8xf32>
    %188 = arith.mulf %185, %187 : vector<8x8xf32>
    %c8_146 = arith.constant 8 : index
    %c0_147 = arith.constant 0 : index
    %189 = vector.load %arg10[%c8_146, %c0_147] : memref<32x8xf32, #tpu.memory_space<vmem>>, vector<8x8xf32>
    %c5_148 = arith.constant 5 : index
    %c1_149 = arith.constant 1 : index
    %190 = memref.load %arg6[%c5_148, %c1_149] : memref<8x4xf32, #tpu.memory_space<smem>>
    %191 = vector.broadcast %190 : f32 to vector<8x8xf32>
    %192 = arith.mulf %189, %191 : vector<8x8xf32>
    %193 = arith.addf %188, %192 : vector<8x8xf32>
    %c16_150 = arith.constant 16 : index
    %c0_151 = arith.constant 0 : index
    %194 = vector.load %arg10[%c16_150, %c0_151] : memref<32x8xf32, #tpu.memory_space<vmem>>, vector<8x8xf32>
    %c5_152 = arith.constant 5 : index
    %c2_153 = arith.constant 2 : index
    %195 = memref.load %arg6[%c5_152, %c2_153] : memref<8x4xf32, #tpu.memory_space<smem>>
    %196 = vector.broadcast %195 : f32 to vector<8x8xf32>
    %197 = arith.mulf %194, %196 : vector<8x8xf32>
    %198 = arith.addf %193, %197 : vector<8x8xf32>
    %c24_154 = arith.constant 24 : index
    %c0_155 = arith.constant 0 : index
    %199 = vector.load %arg10[%c24_154, %c0_155] : memref<32x8xf32, #tpu.memory_space<vmem>>, vector<8x8xf32>
    %c5_156 = arith.constant 5 : index
    %c3_157 = arith.constant 3 : index
    %200 = memref.load %arg6[%c5_156, %c3_157] : memref<8x4xf32, #tpu.memory_space<smem>>
    %201 = vector.broadcast %200 : f32 to vector<8x8xf32>
    %202 = arith.mulf %199, %201 : vector<8x8xf32>
    %203 = arith.addf %198, %202 : vector<8x8xf32>
    %c5_158 = arith.constant 5 : index
    %204 = memref.load %arg7[%c5_158] : memref<8xf32, #tpu.memory_space<smem>>
    %205 = vector.broadcast %204 : f32 to vector<8x8xf32>
    %206 = arith.addf %203, %205 : vector<8x8xf32>
    %c0_159 = arith.constant 0 : index
    %c5_160 = arith.constant 5 : index
    %c0_161 = arith.constant 0 : index
    %c0_162 = arith.constant 0 : index
    %207 = vector.load %arg8[%c0_159, %c5_160, %c0_161, %c0_162] : memref<1x8x8x8xf32, #tpu.memory_space<vmem>>, vector<1x1x8x8xf32>
    %208 = vector.shape_cast %207 : vector<1x1x8x8xf32> to vector<8x8xf32>
    %209 = vector.shape_cast %206 : vector<8x8xf32> to vector<1x1x8x8xf32>
    tpu.vector_store %arg8[%c0_159, %c5_160, %c0_161, %c0_162], %209 {strides = array<i32>} : memref<1x8x8x8xf32, #tpu.memory_space<vmem>>, vector<1x1x8x8xf32>,
    %c0_163 = arith.constant 0 : index
    %c0_164 = arith.constant 0 : index
    %210 = vector.load %arg10[%c0_163, %c0_164] : memref<32x8xf32, #tpu.memory_space<vmem>>, vector<8x8xf32>
    %c6 = arith.constant 6 : index
    %c0_165 = arith.constant 0 : index
    %211 = memref.load %arg6[%c6, %c0_165] : memref<8x4xf32, #tpu.memory_space<smem>>
    %212 = vector.broadcast %211 : f32 to vector<8x8xf32>
    %213 = arith.mulf %210, %212 : vector<8x8xf32>
    %c8_166 = arith.constant 8 : index
    %c0_167 = arith.constant 0 : index
    %214 = vector.load %arg10[%c8_166, %c0_167] : memref<32x8xf32, #tpu.memory_space<vmem>>, vector<8x8xf32>
    %c6_168 = arith.constant 6 : index
    %c1_169 = arith.constant 1 : index
    %215 = memref.load %arg6[%c6_168, %c1_169] : memref<8x4xf32, #tpu.memory_space<smem>>
    %216 = vector.broadcast %215 : f32 to vector<8x8xf32>
    %217 = arith.mulf %214, %216 : vector<8x8xf32>
    %218 = arith.addf %213, %217 : vector<8x8xf32>
    %c16_170 = arith.constant 16 : index
    %c0_171 = arith.constant 0 : index
    %219 = vector.load %arg10[%c16_170, %c0_171] : memref<32x8xf32, #tpu.memory_space<vmem>>, vector<8x8xf32>
    %c6_172 = arith.constant 6 : index
    %c2_173 = arith.constant 2 : index
    %220 = memref.load %arg6[%c6_172, %c2_173] : memref<8x4xf32, #tpu.memory_space<smem>>
    %221 = vector.broadcast %220 : f32 to vector<8x8xf32>
    %222 = arith.mulf %219, %221 : vector<8x8xf32>
    %223 = arith.addf %218, %222 : vector<8x8xf32>
    %c24_174 = arith.constant 24 : index
    %c0_175 = arith.constant 0 : index
    %224 = vector.load %arg10[%c24_174, %c0_175] : memref<32x8xf32, #tpu.memory_space<vmem>>, vector<8x8xf32>
    %c6_176 = arith.constant 6 : index
    %c3_177 = arith.constant 3 : index
    %225 = memref.load %arg6[%c6_176, %c3_177] : memref<8x4xf32, #tpu.memory_space<smem>>
    %226 = vector.broadcast %225 : f32 to vector<8x8xf32>
    %227 = arith.mulf %224, %226 : vector<8x8xf32>
    %228 = arith.addf %223, %227 : vector<8x8xf32>
    %c6_178 = arith.constant 6 : index
    %229 = memref.load %arg7[%c6_178] : memref<8xf32, #tpu.memory_space<smem>>
    %230 = vector.broadcast %229 : f32 to vector<8x8xf32>
    %231 = arith.addf %228, %230 : vector<8x8xf32>
    %c0_179 = arith.constant 0 : index
    %c6_180 = arith.constant 6 : index
    %c0_181 = arith.constant 0 : index
    %c0_182 = arith.constant 0 : index
    %232 = vector.load %arg8[%c0_179, %c6_180, %c0_181, %c0_182] : memref<1x8x8x8xf32, #tpu.memory_space<vmem>>, vector<1x1x8x8xf32>
    %233 = vector.shape_cast %232 : vector<1x1x8x8xf32> to vector<8x8xf32>
    %234 = vector.shape_cast %231 : vector<8x8xf32> to vector<1x1x8x8xf32>
    tpu.vector_store %arg8[%c0_179, %c6_180, %c0_181, %c0_182], %234 {strides = array<i32>} : memref<1x8x8x8xf32, #tpu.memory_space<vmem>>, vector<1x1x8x8xf32>,
    %c0_183 = arith.constant 0 : index
    %c0_184 = arith.constant 0 : index
    %235 = vector.load %arg10[%c0_183, %c0_184] : memref<32x8xf32, #tpu.memory_space<vmem>>, vector<8x8xf32>
    %c7 = arith.constant 7 : index
    %c0_185 = arith.constant 0 : index
    %236 = memref.load %arg6[%c7, %c0_185] : memref<8x4xf32, #tpu.memory_space<smem>>
    %237 = vector.broadcast %236 : f32 to vector<8x8xf32>
    %238 = arith.mulf %235, %237 : vector<8x8xf32>
    %c8_186 = arith.constant 8 : index
    %c0_187 = arith.constant 0 : index
    %239 = vector.load %arg10[%c8_186, %c0_187] : memref<32x8xf32, #tpu.memory_space<vmem>>, vector<8x8xf32>
    %c7_188 = arith.constant 7 : index
    %c1_189 = arith.constant 1 : index
    %240 = memref.load %arg6[%c7_188, %c1_189] : memref<8x4xf32, #tpu.memory_space<smem>>
    %241 = vector.broadcast %240 : f32 to vector<8x8xf32>
    %242 = arith.mulf %239, %241 : vector<8x8xf32>
    %243 = arith.addf %238, %242 : vector<8x8xf32>
    %c16_190 = arith.constant 16 : index
    %c0_191 = arith.constant 0 : index
    %244 = vector.load %arg10[%c16_190, %c0_191] : memref<32x8xf32, #tpu.memory_space<vmem>>, vector<8x8xf32>
    %c7_192 = arith.constant 7 : index
    %c2_193 = arith.constant 2 : index
    %245 = memref.load %arg6[%c7_192, %c2_193] : memref<8x4xf32, #tpu.memory_space<smem>>
    %246 = vector.broadcast %245 : f32 to vector<8x8xf32>
    %247 = arith.mulf %244, %246 : vector<8x8xf32>
    %248 = arith.addf %243, %247 : vector<8x8xf32>
    %c24_194 = arith.constant 24 : index
    %c0_195 = arith.constant 0 : index
    %249 = vector.load %arg10[%c24_194, %c0_195] : memref<32x8xf32, #tpu.memory_space<vmem>>, vector<8x8xf32>
    %c7_196 = arith.constant 7 : index
    %c3_197 = arith.constant 3 : index
    %250 = memref.load %arg6[%c7_196, %c3_197] : memref<8x4xf32, #tpu.memory_space<smem>>
    %251 = vector.broadcast %250 : f32 to vector<8x8xf32>
    %252 = arith.mulf %249, %251 : vector<8x8xf32>
    %253 = arith.addf %248, %252 : vector<8x8xf32>
    %c7_198 = arith.constant 7 : index
    %254 = memref.load %arg7[%c7_198] : memref<8xf32, #tpu.memory_space<smem>>
    %255 = vector.broadcast %254 : f32 to vector<8x8xf32>
    %256 = arith.addf %253, %255 : vector<8x8xf32>
    %c0_199 = arith.constant 0 : index
    %c7_200 = arith.constant 7 : index
    %c0_201 = arith.constant 0 : index
    %c0_202 = arith.constant 0 : index
    %257 = vector.load %arg8[%c0_199, %c7_200, %c0_201, %c0_202] : memref<1x8x8x8xf32, #tpu.memory_space<vmem>>, vector<1x1x8x8xf32>
    %258 = vector.shape_cast %257 : vector<1x1x8x8xf32> to vector<8x8xf32>
    %259 = vector.shape_cast %256 : vector<8x8xf32> to vector<1x1x8x8xf32>
    tpu.vector_store %arg8[%c0_199, %c7_200, %c0_201, %c0_202], %259 {strides = array<i32>} : memref<1x8x8x8xf32, #tpu.memory_space<vmem>>, vector<1x1x8x8xf32>,
    return
  }
  func.func @transform_0(%arg0: i32, %arg1: i32) -> (i32, i32, i32, i32) {
    %c0_i32 = arith.constant 0 : i32
    %c0_i32_0 = arith.constant 0 : i32
    %c0_i32_1 = arith.constant 0 : i32
    return %arg0, %c0_i32, %arg1, %c0_i32_0 : i32, i32, i32, i32
  }
  func.func @transform_1(%arg0: i32, %arg1: i32) -> (i32, i32) {
    %c0_i32 = arith.constant 0 : i32
    %c0_i32_0 = arith.constant 0 : i32
    %c0_i32_1 = arith.constant 0 : i32
    return %c0_i32, %c0_i32_0 : i32, i32
  }
  func.func @transform_2(%arg0: i32, %arg1: i32) -> i32 {
    %c0_i32 = arith.constant 0 : i32
    %c0_i32_0 = arith.constant 0 : i32
    return %c0_i32 : i32
  }
  func.func @transform_3(%arg0: i32, %arg1: i32) -> i32 {
    %c0_i32 = arith.constant 0 : i32
    %c0_i32_0 = arith.constant 0 : i32
    return %c0_i32 : i32
  }
  func.func @transform_4(%arg0: i32, %arg1: i32) -> (i32, i32) {
    %c0_i32 = arith.constant 0 : i32
    %c0_i32_0 = arith.constant 0 : i32
    %c0_i32_1 = arith.constant 0 : i32
    return %c0_i32, %c0_i32_0 : i32, i32
  }
  func.func @transform_5(%arg0: i32, %arg1: i32) -> i32 {
    %c0_i32 = arith.constant 0 : i32
    %c0_i32_0 = arith.constant 0 : i32
    return %c0_i32 : i32
  }
  func.func @transform_6(%arg0: i32, %arg1: i32) -> (i32, i32, i32, i32) {
    %c0_i32 = arith.constant 0 : i32
    %c0_i32_0 = arith.constant 0 : i32
    %c0_i32_1 = arith.constant 0 : i32
    return %arg0, %c0_i32, %arg1, %c0_i32_0 : i32, i32, i32, i32
  }
}

</mosaic_0001>

<bundles_post_ra>
// kernel: tpu_custom_call.1
= control target key start
LH: loop header
LB: loop body
LE: loop exit
PB: predicated region body
PF: predicated region fallthrough
CT: control target
= control target key end

     0   :  { %s1535_s0 = inlined_call_operand.hbm [shape: f32[2,4,8,32], index: 0, kind: input, shape index: {}]   ;;  %s1536_s1 = inlined_call_operand.vmem [shape: f32[32,8], index: 1, kind: input, shape index: {}]   ;;  %s1537_s2 = inlined_call_operand.vmem [shape: f32[4], index: 2, kind: input, shape index: {}]   ;;  %s1538_s3 = inlined_call_operand.vmem [shape: f32[4], index: 3, kind: input, shape index: {}]   ;;  %s1539_s4 = inlined_call_operand.vmem [shape: f32[8,4], index: 4, kind: input, shape index: {}]   ;;  %s1540_s5 = inlined_call_operand.vmem [shape: f32[8], index: 5, kind: input, shape index: {}]   ;;  %s1541_s6 = inlined_call_operand.hbm [shape: f32[2,8,8,8], index: 6, kind: output, shape index: {}]  }
   0x1   :  { %1555 = sst [smem:[#allocation33_spill]] %s1535_s0 }
   0x2   :  { %1556 = sst [smem:[#allocation34_spill]] %s1536_s1 }
   0x3   :  { %1557 = sst [smem:[#allocation35_spill]] %s1537_s2 }
   0x4   :  { %1558 = sst [smem:[#allocation36_spill]] %s1538_s3 }
   0x5   :  { %1559 = sst [smem:[#allocation37_spill]] %s1539_s4 }
   0x6   :  { %1560 = sst [smem:[#allocation38_spill]] %s1540_s5 }
   0x7   :  { %1561 = sst [smem:[#allocation39_spill]] %s1541_s6 }
   0x8   :  { %11 = vsyncpa [#allocation5], 0 }
   0x9   :  { %13 = vsyncpa [#allocation5 + $0x1], 0 }
   0xa   :  { %14 = vsyncpa [#allocation7], 0 }
   0xb   :  { %15 = vsyncpa [#allocation10], 0 }
   0xc   :  { %16 = vsyncpa [#allocation13], 0 }
   0xd   :  { %17 = vsyncpa [#allocation6], 0 }
   0xe   :  { %19 = vsyncpa [#allocation6 + $0x1], 0  ;;  %s1208_s21 = smov 0   ;;  %s1210_s22 = smov 0  }
   0xf   :  { %s1212_s23 = smov 0   ;;  %s1214_s24 = smov 0  }
  0x10   :  { %s1216_s25 = smov 0   ;;  %s1218_s26 = smov 0  }
  0x11 LB: > { %1562 = sst [smem:[#allocation20_spill]] %s1143_s21  ;;  %s777_s27 = sadd.s32 4294967295, %s1163_s26   ;;  %s1163_s26 = sphi %s1218_s26, %s25_s26   ;;  %s1159_s25 = sphi %s1216_s25, %s1601_s25   ;;  %s1155_s24 = sphi %s1214_s24, %s1600_s24   ;;  %s1151_s23 = sphi %s1212_s23, %s1599_s23   ;;  %s1147_s22 = sphi %s1210_s22, %s1598_s22   ;;  %s1143_s21 = sphi %s1208_s21, %s1597_s21  }
  0x12   : > { %1563 = sst [smem:[#allocation21_spill]] %s1147_s22  ;;  %s778_s28 = sadd.s32 4294967294, %s1163_s26  }
  0x13   : > { %1564 = sst [smem:[#allocation22_spill]] %s1151_s23  ;;  %p59_p0 = scmp.ne.s32.totalorder %s1147_s22, %s1143_s21 }
  0x14   : > { %1565 = sst [smem:[#allocation23_spill]] %s1155_s24  ;;  %p1242_p1 = scmp.eq.s32.totalorder %s777_s27, 0 }
  0x15   : > { %1566 = sst [smem:[#allocation24_spill]] %s1159_s25  ;;  %p1246_p2 = scmp.eq.s32.totalorder %s777_s27, 1 }
  0x16   : > { %1567 = sst [smem:[#allocation25_spill]] %s1163_s26  ;;  %p196_p3 = scmp.eq.s32.totalorder %s778_s28, 1 }
  0x17   : > { %p1252_p4 = por %p1242_p1, %p59_p0  ;;  %p779_p5 = scmp.ge.s32.totalorder %s1163_s26, 1 }
  0x18   : > { %p1257_p6 = por %p196_p3, %p59_p0  ;;  %p203_p7 = scmp.lt.s32.totalorder %s1163_s26, 3 }
  0x19   : > { %s1573_s3 = sld [smem:[#allocation36_spill]]  ;;  %p784_p9 = scmp.ge.s32.totalorder %s1163_s26, 2 }
  0x1a   : > { %s1571_s8 = scalar_select %p1257_p6, 1, 0 }
  0x1b   : > { %p1265_p8 = pnand %p779_p5, %p203_p7  ;;  %s1575_s2 = sld [smem:[#allocation35_spill]] }
  0x1c   : > { %1572 = sst [smem:[#allocation26_spill]] %s1571_s8  ;;  %s1165_s19 = smov [#allocation9]  }
  0x1d   : > { %p892_p10 = pneg %p1265_p8  ;;  %s1576_s4 = sld [smem:[#allocation37_spill]] }
  0x1e   : > { %s1166_s20 = smov [#allocation8]   ;;  %s1577_s5 = sld [smem:[#allocation38_spill]] }
  0x1f   : > { %s228_s11 = sshll.u32 %s1573_s3, 4  ;;  %p893_p11 = pnand %p892_p10, %p1242_p1  ;;  %s229_s11 = int_to_ptr.vmem [resolvable:$true] %s228_s11 }
  0x20   : > { %s1167_s10 = smov [#allocation11]   ;;  %s1168_s13 = smov [#allocation12]  }
  0x21   : > { %s218_s15 = sshll.u32 %s1575_s2, 4  ;;  %s37_s14 = sadd.s32 1, %s1159_s25  ;;  %s219_s15 = int_to_ptr.vmem [resolvable:$true] %s218_s15 }
  0x22   : > { %898 = dma.vmem_to_smem (!%p893_p11), %s229_s11, 16, %s1165_s19, [#allocation10]  }
  0x23   : > { %s238_s18 = sshll.u32 %s1576_s4, 4  ;;  %s46_s16 = sadd.s32 1, %s1151_s23  ;;  %s239_s18 = int_to_ptr.vmem [resolvable:$true] %s238_s18 }
  0x24   : > { %895 = dma.vmem_to_smem (!%p893_p11), %s219_s15, 16, %s1166_s20, [#allocation7]  }
  0x25   : > { %s248_s9 = sshll.u32 %s1577_s5, 4  ;;  %p39_p12 = scmp.ge.s32.totalorder %s37_s14, 2  ;;  %s249_s9 = int_to_ptr.vmem [resolvable:$true] %s248_s9 }
  0x26   : > { %901 = dma.vmem_to_smem (!%p893_p11), %s239_s18, 128, %s1167_s10, [#allocation10]  }
  0x27   : > { %904 = dma.vmem_to_smem (!%p893_p11), %s249_s9, 16, %s1168_s13, [#allocation13]  }
  0x28   : > { %p53_p13 = scmp.ne.s32.totalorder %s1151_s23, %s1147_s22  ;;  %p54_p0 = scmp.eq.s32.totalorder %s1163_s26, 0 }
  0x29   : > { %p917_p3 = scmp.lt.s32.totalorder %s1163_s26, 2  ;;  %s1603_s14 = smov (%p39_p12, %s37_s14), 0 }
  0x2a   : > { %1578 = sst [smem:[#allocation27_spill]] %s1603_s14  ;;  %p1291_p5 = por %p54_p0, %p53_p13 }
  0x2b   : > { %p1297_p7 = por %p1246_p2, %p53_p13  ;;  %s41_s17 = ssub.s32 %s1159_s25, %s1603_s14 }
  0x2c   : > { %s259_s18 = sand.u32 1, %s1151_s23   ;;  %p44_p10 = scmp.eq.s32.totalorder %s41_s17, 0 }
  0x2d   : > { %s1580_s15 = scalar_select %p1297_p7, 1, 0 }
  0x2e   : > { %s785_s19 = sshll.u32 %s259_s18, 5  ;;  %s858_s20 = sshll.u32 %s1159_s25, 5 }
  0x2f   : > { %1581 = sst [smem:[#allocation28_spill]] %s1580_s15  ;;  %s263_s2 = scalar_lea.vmem [#allocation4], %s785_s19 }
  0x30   : > { %s1306_s27 = scalar_select %p44_p10, %s1151_s23, %s46_s16  }
  0x31   : > { %s1583_s0 = sld [smem:[#allocation33_spill]]  ;;  %s272_s3 = sshll.u32 %s263_s2, 4  ;;  %s273_s3 = int_to_ptr.vmem [resolvable:$true] %s272_s3 }
  0x32   : > { %1582 = sst [smem:[#allocation29_spill]] %s1306_s27  ;;  %p906_p2 = pnand %p917_p3, %p1291_p5 }
  0x33   : > { %s260_s30 = scalar_lea.sflag [#allocation5], %s259_s18  ;;  %s1169_s4 = smov 128  }
  0x34   : > { %s1170_s5 = smov 8  }
  0x35   : > { %284 = sbr.rel (%p1265_p8) target bundleno = 258 (0x102), region = 44 }
  0x37   : > { %s269_s10 = scalar_lea.hbm %s1583_s0, %s858_s20 }
  0x38   : > { %s270_s13 = sshll.u32 %s269_s10, 4  ;;  %s271_s13 = int_to_ptr.hbm [resolvable:$true] %s270_s13 }
  0x39   : > { %908 = dma.hbm_to_vmem [thread:$0]  (!%p906_p2), %s271_s13, 512, %s273_s3, %s260_s30, %s1169_s4, %s1169_s4, %s1170_s5  }
  0x3a   : > { %s1318_s16 = sand.u32 1, %s1147_s22  }
  0x3b   : > { %1584 = sst [smem:[#allocation30_spill]] %s1318_s16  ;;  %s789_s17 = sshll.u32 %s1318_s16, 5 }
  0x3c   : > { %s287_s2 = scalar_lea.sflag [#allocation5], %s1318_s16  ;;  %s1322_s19 = scalar_lea.vmem [#allocation4], %s789_s17 }
  0x3d   : > { %1122 = dma.done.wait (%p1252_p4), %s287_s2, 512  }
  0x3e   : > { %1124 = vsyncadd (%p1252_p4), %s287_s2, 4294966784 }
  0x3f   : > { %1126 = dma.done.wait (%p1242_p1), [#allocation7], 16  }
  0x40   : > { %1128 = vsyncadd (%p1242_p1), [#allocation7], 4294967280 }
  0x41   : > { %1130 = dma.done.wait (%p1242_p1), [#allocation10], 144  }
  0x42   : > { %1132 = vsyncadd (%p1242_p1), [#allocation10], 4294967152 }
  0x43   : > { %1134 = dma.done.wait (%p1242_p1), [#allocation13], 16  }
  0x44   : > { %1136 = vsyncadd (%p1242_p1), [#allocation13], 4294967280 }
  0x45   : > { %316 = sfence }
  0x46   : > { %s1585_s1 = sld [smem:[#allocation34_spill]]  ;;  %v341_v4 = vld [vmem:[%s1322_s19] sm:$0xff]  ;;  %v795_v6 = vld [vmem:[%s1322_s19 + $0x8] sm:$0xff]  ;;  %v798_v10 = vld [vmem:[%s1322_s19 + $0x10] sm:$0xff]  ;;  %vm351_vm1 = vcmask 261120   ;;  %vm438_vm5 = vcmask 64512  }
  0x47   : > { %s342_s12 = sld [smem:[#allocation8]]  ;;  %v801_v18 = vld [vmem:[%s1322_s19 + $0x18] sm:$0xff] }
  0x48   : > { %s345_s11 = sld [smem:[#allocation9]] }
  0x49   : > { %s796_s20 = sld [smem:[#allocation8 + $0x1]] }
  0x4a   : > { %s797_s28 = sld [smem:[#allocation9 + $0x1]] }
  0x4b   : > { %s799_s13 = sld [smem:[#allocation8 + $0x2]] }
  0x4c   : > { %v396_v0 = vld [vmem:[%s1585_s1 + $0x18] sm:$0xff]  ;;  %v395_v1 = vld [vmem:[%s1585_s1 + $0x10] sm:$0xff]  ;;  %v394_v2 = vld [vmem:[%s1585_s1 + $0x8] sm:$0xff]  ;;  %s800_s30 = sld [smem:[#allocation9 + $0x2]] }
  0x4d   : > { %861 = vmatpush.msra.mxu2 %v396_v0  ;;  %862 = vmatpush.msra.mxu3 %v396_v0  ;;  %v393_v3 = vld [vmem:[%s1585_s1] sm:$0xff]  ;;  %v343_v5 = vstv %s342_s12  ;;  %s802_s17 = sld [smem:[#allocation8 + $0x3]] }
  0x4e   : > { %421 = vmatpush.msra.mxu0 %v396_v0  ;;  %860 = vmatpush.msra.mxu1 %v396_v0  ;;  %v344_v7 = vmul.f32 %v343_v5, %v341_v4  ;;  %v346_v8 = vstv %s345_s11  ;;  %s803_s2 = sld [smem:[#allocation9 + $0x3]] }
  0x4f   : > { %864 = vmatpush.msra.mxu2 %v395_v1  ;;  %865 = vmatpush.msra.mxu3 %v395_v1  ;;  %v356_v9 = vstv %s796_s20  ;;  %s1364_s19 = sld [smem:[#allocation11]] }
  0x50   : > { %422 = vmatpush.msra.mxu0 %v395_v1  ;;  %863 = vmatpush.msra.mxu1 %v395_v1  ;;  %v347_v11 = vadd.f32 %v346_v8, %v344_v7  ;;  %v357_v12 = vmul.f32 %v795_v6, %v356_v9  ;;  %v359_v13 = vstv %s797_s28  ;;  %s1366_s3 = sld [smem:[#allocation11 + $0x80]] }
  0x51   : > { %867 = vmatpush.msra.mxu2 %v394_v2  ;;  %868 = vmatpush.msra.mxu3 %v394_v2  ;;  %v368_v14 = vstv %s799_s13  ;;  %s1368_s4 = sld [smem:[#allocation11 + $0x100]] }
  0x52   : > { %423 = vmatpush.msra.mxu0 %v394_v2  ;;  %866 = vmatpush.msra.mxu1 %v394_v2  ;;  %vm348_vm0 = vcmp.ge.f32.partialorder %v347_v11, 0.0  ;;  %v349_v15 = vmul.f32 0.01, %v347_v11  ;;  %v360_v16 = vadd.f32 %v359_v13, %v357_v12  ;;  %v369_v17 = vmul.f32 %v798_v10, %v368_v14  ;;  %s1370_s5 = sld [smem:[#allocation11 + $0x180]] }
  0x53   : > { %870 = vmatpush.msra.mxu2 %v393_v3  ;;  %871 = vmatpush.msra.mxu3 %v393_v3  ;;  %v371_v19 = vstv %s800_s30  ;;  %v380_v20 = vstv %s802_s17  ;;  %s1372_s7 = sld [smem:[#allocation11 + $0x200]] }
  0x54   : > { %424 = vmatpush.msra.mxu0 %v393_v3  ;;  %869 = vmatpush.msra.mxu1 %v393_v3  ;;  %v350_v21 = vsel %vm348_vm0, %v347_v11, %v349_v15  ;;  %vm361_vm2 = vcmp.ge.f32.partialorder %v360_v16, 0.0  ;;  %v362_v22 = vmul.f32 0.01, %v360_v16  ;;  %v372_v23 = vadd.f32 %v371_v19, %v369_v17  ;;  %s1374_s12 = sld [smem:[#allocation11 + $0x280]] }
  0x55   : > { %352 = vst.msk [vmem:[#allocation2] sm:$0xff] %vm351_vm1, %v350_v21  ;;  %v381_v24 = vmul.f32 %v801_v18, %v380_v20  ;;  %v383_v25 = vstv %s803_s2  ;;  %s1376_s11 = sld [smem:[#allocation11 + $0x300]]  ;;  %v445_v38 = vstv %s1364_s19 }
  0x56   : > { %v363_v26 = vsel %vm361_vm2, %v360_v16, %v362_v22  ;;  %vm373_vm3 = vcmp.ge.f32.partialorder %v372_v23, 0.0  ;;  %v374_v27 = vmul.f32 0.01, %v372_v23  ;;  %s1378_s18 = sld [smem:[#allocation11 + $0x380]]  ;;  %v468_v39 = vstv %s1366_s3 }
  0x57   : > { %364 = vst.msk [vmem:[#allocation2 + $0x8] sm:$0xff] %vm351_vm1, %v363_v26  ;;  %v384_v28 = vadd.f32 %v383_v25, %v381_v24  ;;  %s1380_s29 = sld [smem:[#allocation11 + $0x1]]  ;;  %v492_v40 = vstv %s1368_s4 }
  0x58   : > { %v375_v29 = vsel %vm373_vm3, %v372_v23, %v374_v27  ;;  %s1382_s20 = sld [smem:[#allocation11 + $0x81]]  ;;  %v516_v41 = vstv %s1370_s5 }
  0x59   : > { %376 = vst.msk [vmem:[#allocation2 + $0x10] sm:$0xff] %vm351_vm1, %v375_v29  ;;  %vm385_vm4 = vcmp.ge.f32.partialorder %v384_v28, 0.0  ;;  %v386_v30 = vmul.f32 0.01, %v384_v28  ;;  %s1384_s28 = sld [smem:[#allocation11 + $0x101]]  ;;  %v540_v42 = vstv %s1372_s7 }
  0x5a   : > { %s1386_s9 = sld [smem:[#allocation11 + $0x181]]  ;;  %v564_v43 = vstv %s1374_s12 }
  0x5b   : > { %v387_v31 = vsel %vm385_vm4, %v384_v28, %v386_v30  ;;  %s1388_s10 = sld [smem:[#allocation11 + $0x201]]  ;;  %v588_v44 = vstv %s1376_s11 }
  0x5c   : > { %388 = vst.msk [vmem:[#allocation2 + $0x18] sm:$0xff] %vm351_vm1, %v387_v31  ;;  %v389_v32 = vld [vmem:[#allocation2] sm:$0xff]  ;;  %s1390_s13 = sld [smem:[#allocation11 + $0x281]]  ;;  %v612_v45 = vstv %s1378_s18 }
  0x5d   : > { %804 = vmatmul.msk.f32.vlgmr.msra.gmra.mxu0 %vm351_vm1, %v389_v32  ;;  %s1392_s30 = sld [smem:[#allocation11 + $0x301]]  ;;  %v449_v46 = vstv %s1380_s29 }
  0x5e   : > { %v390_v33 = vld [vmem:[#allocation2 + $0x8] sm:$0xff]  ;;  %s1394_s17 = sld [smem:[#allocation11 + $0x381]]  ;;  %v472_v47 = vstv %s1382_s20 }
  0x5f   : > { %805 = vmatmul.msk.f32.vlgmr.msra.gmra.mxu1 %vm351_vm1, %v390_v33  ;;  %s1396_s2 = sld [smem:[#allocation11 + $0x2]]  ;;  %v496_v48 = vstv %s1384_s28 }
  0x60   : > { %v391_v34 = vld [vmem:[#allocation2 + $0x10] sm:$0xff]  ;;  %s1398_s0 = sld [smem:[#allocation11 + $0x82]]  ;;  %v520_v49 = vstv %s1386_s9 }
  0x61   : > { %806 = vmatmul.msk.f32.vlgmr.msra.gmra.mxu2 %vm351_vm1, %v391_v34  ;;  %s1400_s1 = sld [smem:[#allocation11 + $0x102]]  ;;  %v544_v50 = vstv %s1388_s10 }
  0x62   : > { %s1402_s14 = sld [smem:[#allocation11 + $0x182]]  ;;  %v568_v51 = vstv %s1390_s13 }
  0x63   : > { %v392_v35 = vld [vmem:[#allocation2 + $0x18] sm:$0xff]  ;;  %s1404_s25 = sld [smem:[#allocation11 + $0x202]]  ;;  %v592_v52 = vstv %s1392_s30 }
  0x64   : > { %807 = vmatmul.msk.f32.vlgmr.msra.gmra.mxu3 %vm351_vm1, %v392_v35  ;;  %s1406_s27 = sld [smem:[#allocation11 + $0x282]]  ;;  %v616_v53 = vstv %s1394_s17 }
  0x65   : > { %s1408_s23 = sld [smem:[#allocation11 + $0x302]]  ;;  %v454_v55 = vstv %s1396_s2 }
  0x66   : > { %s1410_s22 = sld [smem:[#allocation11 + $0x382]]  ;;  %v477_v56 = vstv %s1398_s0 }
  0x67   : > { %s1412_s26 = sld [smem:[#allocation11 + $0x3]]  ;;  %v501_v57 = vstv %s1400_s1 }
  0x68   : > { %s1414_s8 = sld [smem:[#allocation12]]  ;;  %v525_v58 = vstv %s1402_s14 }
  0x69   : > { %s1416_s21 = sld [smem:[#allocation11 + $0x83]]  ;;  %v549_v59 = vstv %s1404_s25 }
  0x6a   : > { %s1418_s15 = sld [smem:[#allocation12 + $0x1]]  ;;  %v573_v60 = vstv %s1406_s27 }
  0x6b   : > { %s1421_s6 = sld [smem:[#allocation11 + $0x103]]  ;;  %v597_v61 = vstv %s1408_s23 }
  0x6c   : > { %s1423_s24 = sld [smem:[#allocation11 + $0x183]]  ;;  %v621_v62 = vstv %s1410_s22 }
  0x6d   : > { %s1426_s16 = sld [smem:[#allocation12 + $0x2]]  ;;  %v459_v1 = vstv %s1412_s26 }
  0x6e   : > { %1586 = sst [smem:[#allocation31_spill]] %s1414_s8 }
  0x6f   : > { %s1438_s8 = sld [smem:[#allocation11 + $0x283]]  ;;  %v482_v2 = vstv %s1416_s21 }
  0x70   : > { %1587 = sst [smem:[#allocation32_spill]] %s1418_s15 }
  0x71   : > { %s1432_s15 = sld [smem:[#allocation11 + $0x203]]  ;;  %v506_v3 = vstv %s1421_s6 }
  0x72   : > { %s1444_s19 = sld [smem:[#allocation11 + $0x303]]  ;;  %v530_v4 = vstv %s1423_s24 }
  0x73   : > { %s1450_s3 = sld [smem:[#allocation11 + $0x383]]  ;;  %v510_v28 = vstv %s1426_s16 }
  0x74   : > { %s1456_s4 = sld [smem:[#allocation12 + $0x3]] }
  0x75   : > { %s1588_s0 = sld [smem:[#allocation31_spill]]  ;;  %v578_v23 = vstv %s1438_s8 }
  0x76   : > { %s1589_s1 = sld [smem:[#allocation32_spill]] }
  0x77   : > { %v554_v22 = vstv %s1432_s15  ;;  %s1476_s6 = sld [smem:[#allocation12 + $0x4]] }
  0x78   : > { %v602_v24 = vstv %s1444_s19  ;;  %s1478_s21 = sld [smem:[#allocation12 + $0x5]] }
  0x79   : > { %v626_v25 = vstv %s1450_s3  ;;  %s1590_s22 = sld [smem:[#allocation30_spill]] }
  0x7a   : > { %v534_v29 = vstv %s1456_s4  ;;  %s1480_s23 = sld [smem:[#allocation12 + $0x6]] }
  0x7b   : > { %v463_v26 = vstv %s1588_s0  ;;  %s1591_s24 = sld [smem:[#allocation23_spill]] }
  0x7c   : > { %v486_v27 = vstv %s1589_s1  ;;  %s1482_s25 = sld [smem:[#allocation12 + $0x7]] }
  0x7d   : > { %s1592_s27 = sld [smem:[#allocation39_spill]] }
  0x7f   : > { %s794_s26 = sshll.u32 %s1590_s22, 6  ;;  %s635_s18 = scalar_lea.sflag [#allocation6], %s1590_s22 }
  0x80   : > { %s340_s5 = scalar_lea.vmem [#allocation14], %s794_s26 }
  0x81   : > { %s859_s8 = sshll.u32 %s1591_s24, 6  ;;  %s648_s7 = sshll.u32 %s340_s5, 4  ;;  %s649_s7 = int_to_ptr.vmem [resolvable:$true] %s648_s7 }
  0x83   : > { %s647_s16 = scalar_lea.hbm %s1592_s27, %s859_s8  ;;  %s1089_s10 = scalar_lea.hbm %s1592_s27, 128 }
  0x84   : > { %s650_s12 = sshll.u32 %s647_s16, 4  ;;  %s651_s12 = int_to_ptr.hbm [resolvable:$true] %s650_s12 }
  0x85   : > { %s1083_s29 = sshra.s32 %s651_s12, 4  ;;  %s1084_s29 = int_to_ptr.hbm [resolvable:$true] %s1083_s29 }
  0x86   : > { %s1085_s20 = scalar_lea.hbm %s1084_s29, 64  ;;  %p1090_p11 = scmp.lt.s32.totalorder %s1084_s29, %s1592_s27 }
  0x87   : > { %p1086_p1 = scmp.ne.s32.totalorder %s1084_s29, %s1085_s20  ;;  %p1091_p12 = scmp.lt.s32.totalorder %s1089_s10, %s1085_s20 }
  0x89   : > { %p1087_p4 = pnand %p1086_p1, %p1297_p7  ;;  %p1092_p13 = por %p1091_p12, %p1090_p11 }
  0x8b   : > { %p1088_p8 = pneg %p1087_p4 }
  0x8d   : > { %p1093_p0 = pnand %p1092_p13, %p1088_p8 }
  0xda   : > { %v426_v36 = vpop.f32.mrf.mxu0 }
  0xdb   : > { %439 = vst.msk [vmem:[#allocation3] sm:$0xff] %vm438_vm5, %v426_v36 }
  0xdc   : > { %v429_v37 = vpop.f32.mrf.mxu1 }
  0xdd   : > { %440 = vst.msk [vmem:[#allocation3 + $0x8] sm:$0xff] %vm438_vm5, %v429_v37 }
  0xe2   : > { %v443_v54 = vld [vmem:[#allocation3] sm:$0xff] }
  0xe3   : > { %v446_v5 = vmul.f32 %v445_v38, %v443_v54  ;;  %v469_v6 = vmul.f32 %v468_v39, %v443_v54  ;;  %v493_v7 = vmul.f32 %v492_v40, %v443_v54  ;;  %v517_v8 = vmul.f32 %v516_v41, %v443_v54 }
  0xe4   : > { %v447_v63 = vld [vmem:[#allocation3 + $0x8] sm:$0xff]  ;;  %v432_v0 = vpop.f32.mrf.mxu2  ;;  %v541_v9 = vmul.f32 %v540_v42, %v443_v54  ;;  %v565_v10 = vmul.f32 %v564_v43, %v443_v54  ;;  %v589_v11 = vmul.f32 %v588_v44, %v443_v54  ;;  %v613_v12 = vmul.f32 %v612_v45, %v443_v54 }
  0xe5   : > { %441 = vst.msk [vmem:[#allocation3 + $0x10] sm:$0xff] %vm438_vm5, %v432_v0  ;;  %v450_v13 = vmul.f32 %v449_v46, %v447_v63  ;;  %v473_v14 = vmul.f32 %v472_v47, %v447_v63  ;;  %v497_v15 = vmul.f32 %v496_v48, %v447_v63  ;;  %v521_v16 = vmul.f32 %v520_v49, %v447_v63 }
  0xe6   : > { %v545_v18 = vmul.f32 %v544_v50, %v447_v63  ;;  %v569_v19 = vmul.f32 %v568_v51, %v447_v63  ;;  %v593_v20 = vmul.f32 %v592_v52, %v447_v63  ;;  %v617_v21 = vmul.f32 %v616_v53, %v447_v63 }
  0xe7   : > { %v435_v17 = vpop.f32.mrf.mxu3  ;;  %v451_v30 = vadd.f32 %v450_v13, %v446_v5  ;;  %v474_v31 = vadd.f32 %v473_v14, %v469_v6  ;;  %v498_v32 = vadd.f32 %v497_v15, %v493_v7  ;;  %v522_v33 = vadd.f32 %v521_v16, %v517_v8 }
  0xe8   : > { %442 = vst.msk [vmem:[#allocation3 + $0x18] sm:$0xff] %vm438_vm5, %v435_v17  ;;  %v546_v34 = vadd.f32 %v545_v18, %v541_v9  ;;  %v570_v35 = vadd.f32 %v569_v19, %v565_v10  ;;  %v594_v36 = vadd.f32 %v593_v20, %v589_v11  ;;  %v618_v37 = vadd.f32 %v617_v21, %v613_v12 }
  0xe9   : > { %v558_v9 = vstv %s1476_s6  ;;  %v606_v13 = vstv %s1480_s23  ;;  %v630_v16 = vstv %s1482_s25 }
  0xec   : > { %v452_v38 = vld [vmem:[#allocation3 + $0x10] sm:$0xff] }
  0xed   : > { %v455_v39 = vmul.f32 %v454_v55, %v452_v38  ;;  %v478_v40 = vmul.f32 %v477_v56, %v452_v38  ;;  %v502_v41 = vmul.f32 %v501_v57, %v452_v38  ;;  %v526_v42 = vmul.f32 %v525_v58, %v452_v38 }
  0xee   : > { %v550_v43 = vmul.f32 %v549_v59, %v452_v38  ;;  %v574_v44 = vmul.f32 %v573_v60, %v452_v38  ;;  %v598_v45 = vmul.f32 %v597_v61, %v452_v38  ;;  %v622_v46 = vmul.f32 %v621_v62, %v452_v38 }
  0xef   : > { %v456_v47 = vadd.f32 %v455_v39, %v451_v30  ;;  %v479_v48 = vadd.f32 %v478_v40, %v474_v31  ;;  %v503_v49 = vadd.f32 %v502_v41, %v498_v32  ;;  %v527_v50 = vadd.f32 %v526_v42, %v522_v33  ;;  %v457_v51 = vld [vmem:[#allocation3 + $0x18] sm:$0xff] }
  0xf0   : > { %v551_v52 = vadd.f32 %v550_v43, %v546_v34  ;;  %v575_v53 = vadd.f32 %v574_v44, %v570_v35  ;;  %v599_v54 = vadd.f32 %v598_v45, %v594_v36  ;;  %v623_v55 = vadd.f32 %v622_v46, %v618_v37 }
  0xf1   : > { %v460_v56 = vmul.f32 %v459_v1, %v457_v51  ;;  %v483_v57 = vmul.f32 %v482_v2, %v457_v51  ;;  %v507_v58 = vmul.f32 %v506_v3, %v457_v51  ;;  %v531_v59 = vmul.f32 %v530_v4, %v457_v51 }
  0xf2   : > { %v555_v60 = vmul.f32 %v554_v22, %v457_v51  ;;  %v579_v61 = vmul.f32 %v578_v23, %v457_v51  ;;  %v603_v62 = vmul.f32 %v602_v24, %v457_v51  ;;  %v627_v63 = vmul.f32 %v626_v25, %v457_v51 }
  0xf3   : > { %v461_v0 = vadd.f32 %v460_v56, %v456_v47  ;;  %v484_v5 = vadd.f32 %v483_v57, %v479_v48  ;;  %v508_v6 = vadd.f32 %v507_v58, %v503_v49  ;;  %v532_v7 = vadd.f32 %v531_v59, %v527_v50 }
  0xf4   : > { %v556_v8 = vadd.f32 %v555_v60, %v551_v52  ;;  %v580_v10 = vadd.f32 %v579_v61, %v575_v53  ;;  %v582_v1 = vstv %s1478_s21  ;;  %v604_v4 = vadd.f32 %v603_v62, %v599_v54 }
  0xf5   : > { %v464_v2 = vadd.f32 %v463_v26, %v461_v0  ;;  %v487_v11 = vadd.f32 %v486_v27, %v484_v5  ;;  %v511_v3 = vadd.f32 %v510_v28, %v508_v6  ;;  %v535_v12 = vadd.f32 %v534_v29, %v532_v7 }
  0xf6   : > { %v628_v14 = vadd.f32 %v627_v63, %v623_v55  ;;  %v559_v15 = vadd.f32 %v558_v9, %v556_v8  ;;  %v583_v17 = vadd.f32 %v582_v1, %v580_v10  ;;  %v607_v18 = vadd.f32 %v606_v13, %v604_v4 }
  0xf7   : > { %465 = vst.msk [vmem:[%s340_s5] sm:$0xff] %vm438_vm5, %v464_v2 }
  0xf8   : > { %816 = vst.msk [vmem:[%s340_s5 + $0x8] sm:$0xff] %vm438_vm5, %v487_v11  ;;  %v631_v19 = vadd.f32 %v630_v16, %v628_v14 }
  0xf9   : > { %822 = vst.msk [vmem:[%s340_s5 + $0x10] sm:$0xff] %vm438_vm5, %v511_v3 }
  0xfa   : > { %828 = vst.msk [vmem:[%s340_s5 + $0x18] sm:$0xff] %vm438_vm5, %v535_v12 }
  0xfb   : > { %834 = vst.msk [vmem:[%s340_s5 + $0x20] sm:$0xff] %vm438_vm5, %v559_v15 }
  0xfc   : > { %840 = vst.msk [vmem:[%s340_s5 + $0x28] sm:$0xff] %vm438_vm5, %v583_v17 }
  0xfd   : > { %846 = vst.msk [vmem:[%s340_s5 + $0x30] sm:$0xff] %vm438_vm5, %v607_v18 }
  0xfe   : > { %852 = vst.msk [vmem:[%s340_s5 + $0x38] sm:$0xff] %vm438_vm5, %v631_v19 }
  0xff   : > { %1096 = shalt.err (!%p1093_p0)
}
 0x100   : > { %s1171_s17 = smov 128   ;;  %s1172_s2 = smov 8  }
 0x101   : > { %890 = dma.vmem_to_hbm [thread:$0]  (%p1297_p7), %s649_s7, 1024, %s651_s12, %s635_s18, %s1171_s17, %s1171_s17, %s1172_s2  }
 0x102 PF: > { %s1594_s19 = sld [smem:[#allocation20_spill]]  ;;  %p910_p3 = pnand %p784_p9, %p1257_p6 }
 0x103   : > { %s1596_s4 = sld [smem:[#allocation25_spill]] }
 0x104   : > { %p911_p5 = pneg %p910_p3 }
 0x108   : > { %s665_s0 = sand.u32 1, %s1594_s19  }
 0x109   : > { %s666_s1 = scalar_lea.sflag [#allocation6], %s665_s0 }
 0x10a   : > { %1138 = dma.done.wait (%p911_p5), %s666_s1, 1024  }
 0x10b   : > { %1140 = vsyncadd (%p911_p5), %s666_s1, 4294966272  ;;  %s25_s26 = sadd.s32 1, %s1596_s4   ;;  %s1597_s21 = sld [smem:[#allocation21_spill]] }
 0x10c   : > { %p22_p10 = scmp.ge.s32.totalorder %s25_s26, 4   ;;  %s1598_s22 = sld [smem:[#allocation22_spill]] }
 0x10d   : > { %s1599_s23 = sld [smem:[#allocation29_spill]] }
 0x10e   : > { %s1600_s24 = sld [smem:[#allocation24_spill]]  ;;  %24 = sbr.rel (!%p22_p10) target bundleno = 17 (0x11), region = 116 }
 0x10f   : > { %s1601_s25 = sld [smem:[#allocation27_spill]] }
 0x113   :  { %672 = vsyncpa [#allocation5], 1 }
 0x114   :  { %674 = vsyncpa [#allocation5 + $0x1], 1 }
 0x115   :  { %675 = vsyncpa [#allocation6], 1 }
 0x116   :  { %677 = vsyncpa [#allocation6 + $0x1], 1 }
 0x117   :  { %678 = vsyncpa [#allocation7], 1 }
 0x118   :  { %680 = vsyncpa [#allocation7 + $0x1], 1 }
 0x119   :  { %681 = vsyncpa [#allocation10], 1 }
 0x11a   :  { %682 = vsyncpa [#allocation13], 1 }

</bundles_post_ra>
